<compile_context>
chip_gen: v7x
topology: tpu7x:2x2x1
jax: 0.10.0
libtpu: 0.0.40
codegen_flags: <defaults>
</compile_context>

<pallas_src>
import jax
import jax.numpy as jnp
from jax.experimental import pallas as pl
from jax.experimental.pallas import tpu as pltpu


def _gather_kernel(ids_ref, emb_hbm, out_ref, sems):
    # ids_ref:  (N_pad,) int32 in SMEM (scalar prefetch)
    # emb_hbm:  (V, D) embedding table, left in HBM (pl.ANY) -- never copied wholesale
    # out_ref:  (TT, D) VMEM output block for this grid step
    # sems:     (TT,) DMA completion semaphores
    i = pl.program_id(0)
    tt = out_ref.shape[0]

    # Issue TT concurrent single-row gathers (static unroll), then wait on all.
    copies = []
    for t in range(tt):
        tok = ids_ref[i * tt + t]              # dynamic scalar read from SMEM
        cp = pltpu.make_async_copy(
            emb_hbm.at[pl.ds(tok, 1), :],      # gathered (1, D) row in HBM
            out_ref.at[pl.ds(t, 1), :],        # lands directly in the output block
            sems.at[t],
        )
        cp.start()
        copies.append(cp)
    for cp in copies:
        cp.wait()


def input_embedding(token_ids, embedding_table, *, token_tile=8):
    """token_ids: (B, T) integer array; embedding_table: (V, D) float array.
    Returns (B, T, D), matching nn.Embedding(vocab_size, d_model)(token_ids)."""
    B, T = token_ids.shape
    V, D = embedding_table.shape
    N = B * T

    # Pad the flattened token stream up to a tile multiple; padded slots gather
    # row 0 and are sliced away afterwards, so arbitrary (B, T) work.
    n_pad = pl.cdiv(N, token_tile) * token_tile
    ids_flat = token_ids.reshape(N).astype(jnp.int32)
    # Clamp like jnp.take's default mode; also keeps every DMA in-bounds.
    ids_flat = jnp.clip(ids_flat, 0, V - 1)
    ids_flat = jnp.pad(ids_flat, (0, n_pad - N))

    out_flat = pl.pallas_call(
        _gather_kernel,
        out_shape=jax.ShapeDtypeStruct((n_pad, D), embedding_table.dtype),
        grid_spec=pltpu.PrefetchScalarGridSpec(
            num_scalar_prefetch=1,                 # ids land in SMEM before the grid runs
            grid=(n_pad // token_tile,),
            in_specs=[
                pl.BlockSpec(memory_space=pl.ANY),  # table stays in HBM; gathered via DMA
            ],
            out_specs=pl.BlockSpec((token_tile, D), lambda i, ids: (i, 0)),
            scratch_shapes=[pltpu.SemaphoreType.DMA((token_tile,))],
        ),
        compiler_params=pltpu.CompilerParams(
            dimension_semantics=("arbitrary",),
        ),
    )(ids_flat, embedding_table)

    return out_flat[:N].reshape(B, T, D)


if __name__ == "__main__":
    # Small, deterministic setup (matches the toy module sizes).
    d_model = 32
    vocab_size = 64
    batch = 2
    seq = 8

    key = jax.random.PRNGKey(0)
    k_emb, k_ids = jax.random.split(key)

    # nn.Embedding default init is N(0, 1).
    embedding_table = jax.random.normal(k_emb, (vocab_size, d_model), dtype=jnp.float32)
    token_ids = jax.random.randint(k_ids, (batch, seq), 0, vocab_size, dtype=jnp.int32)

    out = input_embedding(token_ids, embedding_table)
    out = jax.block_until_ready(out)

    # Reference check (plain JAX gather).
    ref = jnp.take(embedding_table, token_ids, axis=0)
    assert out.shape == (batch, seq, d_model)
    assert jnp.allclose(out, ref, atol=1e-6), "mismatch vs reference gather"

    print("KERNEL_OK")
</pallas_src>

<mosaic_0001>
module attributes {stable_mosaic.version = 11 : i64} {
  func.func @_gather_kernel(%arg0: i32, %arg1: memref<16xi32, #tpu.memory_space<smem>>, %arg2: memref<64x32xf32, #tpu.memory_space<any>>, %arg3: memref<8x32xf32, #tpu.memory_space<vmem>>, %arg4: memref<8x!tpu.dma_semaphore, #tpu.memory_space<semaphore_mem>>) attributes {dimension_semantics = [#tpu.dimension_semantics<arbitrary>], iteration_bounds = array<i64: 2>, scalar_prefetch = 1 : i64, scratch_operands = 1 : i64, tpu.core_type = #tpu.core_type<tc>, window_params = [{}, {transform_indices = @transform_1, window_bounds = array<i64: 8, 32>}]} {
    %c8_i32 = arith.constant 8 : i32
    %0 = arith.muli %arg0, %c8_i32 : i32
    %c0_i32 = arith.constant 0 : i32
    %1 = arith.addi %0, %c0_i32 : i32
    %2 = arith.index_cast %1 : i32 to index
    %3 = memref.load %arg1[%2] : memref<16xi32, #tpu.memory_space<smem>>
    %c0_i32_0 = arith.constant 0 : i32
    %c0_i32_1 = arith.constant 0 : i32
    %4 = tpu.memref_slice %arg2[%3, %c0_i32_1] : memref<64x32xf32, #tpu.memory_space<any>> -> memref<1x32xf32, #tpu.memory_space<any>>
    %c0_i32_2 = arith.constant 0 : i32
    %c0_i32_3 = arith.constant 0 : i32
    %5 = tpu.memref_slice %arg3[%c0_i32_2, %c0_i32_3] : memref<8x32xf32, #tpu.memory_space<vmem>> -> memref<1x32xf32, #tpu.memory_space<vmem>>
    %6 = tpu.memref_slice %arg4[%c0_i32_0] : memref<8x!tpu.dma_semaphore, #tpu.memory_space<semaphore_mem>> -> memref<1x!tpu.dma_semaphore, #tpu.memory_space<semaphore_mem>>
    %7 = tpu.memref_squeeze %6 : memref<1x!tpu.dma_semaphore, #tpu.memory_space<semaphore_mem>> -> memref<!tpu.dma_semaphore, #tpu.memory_space<semaphore_mem>>
    tpu.enqueue_dma source(%4 : memref<1x32xf32, #tpu.memory_space<any>>) target(%5 : memref<1x32xf32, #tpu.memory_space<vmem>>) target_semaphore(%7 : memref<!tpu.dma_semaphore, #tpu.memory_space<semaphore_mem>>)
    %c8_i32_4 = arith.constant 8 : i32
    %8 = arith.muli %arg0, %c8_i32_4 : i32
    %c1_i32 = arith.constant 1 : i32
    %9 = arith.addi %8, %c1_i32 : i32
    %10 = arith.index_cast %9 : i32 to index
    %11 = memref.load %arg1[%10] : memref<16xi32, #tpu.memory_space<smem>>
    %c1_i32_5 = arith.constant 1 : i32
    %c0_i32_6 = arith.constant 0 : i32
    %12 = tpu.memref_slice %arg2[%11, %c0_i32_6] : memref<64x32xf32, #tpu.memory_space<any>> -> memref<1x32xf32, #tpu.memory_space<any>>
    %c1_i32_7 = arith.constant 1 : i32
    %c0_i32_8 = arith.constant 0 : i32
    %13 = tpu.memref_slice %arg3[%c1_i32_7, %c0_i32_8] : memref<8x32xf32, #tpu.memory_space<vmem>> -> memref<1x32xf32, #tpu.memory_space<vmem>>
    %14 = tpu.memref_slice %arg4[%c1_i32_5] : memref<8x!tpu.dma_semaphore, #tpu.memory_space<semaphore_mem>> -> memref<1x!tpu.dma_semaphore, #tpu.memory_space<semaphore_mem>>
    %15 = tpu.memref_squeeze %14 : memref<1x!tpu.dma_semaphore, #tpu.memory_space<semaphore_mem>> -> memref<!tpu.dma_semaphore, #tpu.memory_space<semaphore_mem>>
    tpu.enqueue_dma source(%12 : memref<1x32xf32, #tpu.memory_space<any>>) target(%13 : memref<1x32xf32, #tpu.memory_space<vmem>>) target_semaphore(%15 : memref<!tpu.dma_semaphore, #tpu.memory_space<semaphore_mem>>)
    %c8_i32_9 = arith.constant 8 : i32
    %16 = arith.muli %arg0, %c8_i32_9 : i32
    %c2_i32 = arith.constant 2 : i32
    %17 = arith.addi %16, %c2_i32 : i32
    %18 = arith.index_cast %17 : i32 to index
    %19 = memref.load %arg1[%18] : memref<16xi32, #tpu.memory_space<smem>>
    %c2_i32_10 = arith.constant 2 : i32
    %c0_i32_11 = arith.constant 0 : i32
    %20 = tpu.memref_slice %arg2[%19, %c0_i32_11] : memref<64x32xf32, #tpu.memory_space<any>> -> memref<1x32xf32, #tpu.memory_space<any>>
    %c2_i32_12 = arith.constant 2 : i32
    %c0_i32_13 = arith.constant 0 : i32
    %21 = tpu.memref_slice %arg3[%c2_i32_12, %c0_i32_13] : memref<8x32xf32, #tpu.memory_space<vmem>> -> memref<1x32xf32, #tpu.memory_space<vmem>>
    %22 = tpu.memref_slice %arg4[%c2_i32_10] : memref<8x!tpu.dma_semaphore, #tpu.memory_space<semaphore_mem>> -> memref<1x!tpu.dma_semaphore, #tpu.memory_space<semaphore_mem>>
    %23 = tpu.memref_squeeze %22 : memref<1x!tpu.dma_semaphore, #tpu.memory_space<semaphore_mem>> -> memref<!tpu.dma_semaphore, #tpu.memory_space<semaphore_mem>>
    tpu.enqueue_dma source(%20 : memref<1x32xf32, #tpu.memory_space<any>>) target(%21 : memref<1x32xf32, #tpu.memory_space<vmem>>) target_semaphore(%23 : memref<!tpu.dma_semaphore, #tpu.memory_space<semaphore_mem>>)
    %c8_i32_14 = arith.constant 8 : i32
    %24 = arith.muli %arg0, %c8_i32_14 : i32
    %c3_i32 = arith.constant 3 : i32
    %25 = arith.addi %24, %c3_i32 : i32
    %26 = arith.index_cast %25 : i32 to index
    %27 = memref.load %arg1[%26] : memref<16xi32, #tpu.memory_space<smem>>
    %c3_i32_15 = arith.constant 3 : i32
    %c0_i32_16 = arith.constant 0 : i32
    %28 = tpu.memref_slice %arg2[%27, %c0_i32_16] : memref<64x32xf32, #tpu.memory_space<any>> -> memref<1x32xf32, #tpu.memory_space<any>>
    %c3_i32_17 = arith.constant 3 : i32
    %c0_i32_18 = arith.constant 0 : i32
    %29 = tpu.memref_slice %arg3[%c3_i32_17, %c0_i32_18] : memref<8x32xf32, #tpu.memory_space<vmem>> -> memref<1x32xf32, #tpu.memory_space<vmem>>
    %30 = tpu.memref_slice %arg4[%c3_i32_15] : memref<8x!tpu.dma_semaphore, #tpu.memory_space<semaphore_mem>> -> memref<1x!tpu.dma_semaphore, #tpu.memory_space<semaphore_mem>>
    %31 = tpu.memref_squeeze %30 : memref<1x!tpu.dma_semaphore, #tpu.memory_space<semaphore_mem>> -> memref<!tpu.dma_semaphore, #tpu.memory_space<semaphore_mem>>
    tpu.enqueue_dma source(%28 : memref<1x32xf32, #tpu.memory_space<any>>) target(%29 : memref<1x32xf32, #tpu.memory_space<vmem>>) target_semaphore(%31 : memref<!tpu.dma_semaphore, #tpu.memory_space<semaphore_mem>>)
    %c8_i32_19 = arith.constant 8 : i32
    %32 = arith.muli %arg0, %c8_i32_19 : i32
    %c4_i32 = arith.constant 4 : i32
    %33 = arith.addi %32, %c4_i32 : i32
    %34 = arith.index_cast %33 : i32 to index
    %35 = memref.load %arg1[%34] : memref<16xi32, #tpu.memory_space<smem>>
    %c4_i32_20 = arith.constant 4 : i32
    %c0_i32_21 = arith.constant 0 : i32
    %36 = tpu.memref_slice %arg2[%35, %c0_i32_21] : memref<64x32xf32, #tpu.memory_space<any>> -> memref<1x32xf32, #tpu.memory_space<any>>
    %c4_i32_22 = arith.constant 4 : i32
    %c0_i32_23 = arith.constant 0 : i32
    %37 = tpu.memref_slice %arg3[%c4_i32_22, %c0_i32_23] : memref<8x32xf32, #tpu.memory_space<vmem>> -> memref<1x32xf32, #tpu.memory_space<vmem>>
    %38 = tpu.memref_slice %arg4[%c4_i32_20] : memref<8x!tpu.dma_semaphore, #tpu.memory_space<semaphore_mem>> -> memref<1x!tpu.dma_semaphore, #tpu.memory_space<semaphore_mem>>
    %39 = tpu.memref_squeeze %38 : memref<1x!tpu.dma_semaphore, #tpu.memory_space<semaphore_mem>> -> memref<!tpu.dma_semaphore, #tpu.memory_space<semaphore_mem>>
    tpu.enqueue_dma source(%36 : memref<1x32xf32, #tpu.memory_space<any>>) target(%37 : memref<1x32xf32, #tpu.memory_space<vmem>>) target_semaphore(%39 : memref<!tpu.dma_semaphore, #tpu.memory_space<semaphore_mem>>)
    %c8_i32_24 = arith.constant 8 : i32
    %40 = arith.muli %arg0, %c8_i32_24 : i32
    %c5_i32 = arith.constant 5 : i32
    %41 = arith.addi %40, %c5_i32 : i32
    %42 = arith.index_cast %41 : i32 to index
    %43 = memref.load %arg1[%42] : memref<16xi32, #tpu.memory_space<smem>>
    %c5_i32_25 = arith.constant 5 : i32
    %c0_i32_26 = arith.constant 0 : i32
    %44 = tpu.memref_slice %arg2[%43, %c0_i32_26] : memref<64x32xf32, #tpu.memory_space<any>> -> memref<1x32xf32, #tpu.memory_space<any>>
    %c5_i32_27 = arith.constant 5 : i32
    %c0_i32_28 = arith.constant 0 : i32
    %45 = tpu.memref_slice %arg3[%c5_i32_27, %c0_i32_28] : memref<8x32xf32, #tpu.memory_space<vmem>> -> memref<1x32xf32, #tpu.memory_space<vmem>>
    %46 = tpu.memref_slice %arg4[%c5_i32_25] : memref<8x!tpu.dma_semaphore, #tpu.memory_space<semaphore_mem>> -> memref<1x!tpu.dma_semaphore, #tpu.memory_space<semaphore_mem>>
    %47 = tpu.memref_squeeze %46 : memref<1x!tpu.dma_semaphore, #tpu.memory_space<semaphore_mem>> -> memref<!tpu.dma_semaphore, #tpu.memory_space<semaphore_mem>>
    tpu.enqueue_dma source(%44 : memref<1x32xf32, #tpu.memory_space<any>>) target(%45 : memref<1x32xf32, #tpu.memory_space<vmem>>) target_semaphore(%47 : memref<!tpu.dma_semaphore, #tpu.memory_space<semaphore_mem>>)
    %c8_i32_29 = arith.constant 8 : i32
    %48 = arith.muli %arg0, %c8_i32_29 : i32
    %c6_i32 = arith.constant 6 : i32
    %49 = arith.addi %48, %c6_i32 : i32
    %50 = arith.index_cast %49 : i32 to index
    %51 = memref.load %arg1[%50] : memref<16xi32, #tpu.memory_space<smem>>
    %c6_i32_30 = arith.constant 6 : i32
    %c0_i32_31 = arith.constant 0 : i32
    %52 = tpu.memref_slice %arg2[%51, %c0_i32_31] : memref<64x32xf32, #tpu.memory_space<any>> -> memref<1x32xf32, #tpu.memory_space<any>>
    %c6_i32_32 = arith.constant 6 : i32
    %c0_i32_33 = arith.constant 0 : i32
    %53 = tpu.memref_slice %arg3[%c6_i32_32, %c0_i32_33] : memref<8x32xf32, #tpu.memory_space<vmem>> -> memref<1x32xf32, #tpu.memory_space<vmem>>
    %54 = tpu.memref_slice %arg4[%c6_i32_30] : memref<8x!tpu.dma_semaphore, #tpu.memory_space<semaphore_mem>> -> memref<1x!tpu.dma_semaphore, #tpu.memory_space<semaphore_mem>>
    %55 = tpu.memref_squeeze %54 : memref<1x!tpu.dma_semaphore, #tpu.memory_space<semaphore_mem>> -> memref<!tpu.dma_semaphore, #tpu.memory_space<semaphore_mem>>
    tpu.enqueue_dma source(%52 : memref<1x32xf32, #tpu.memory_space<any>>) target(%53 : memref<1x32xf32, #tpu.memory_space<vmem>>) target_semaphore(%55 : memref<!tpu.dma_semaphore, #tpu.memory_space<semaphore_mem>>)
    %c8_i32_34 = arith.constant 8 : i32
    %56 = arith.muli %arg0, %c8_i32_34 : i32
    %c7_i32 = arith.constant 7 : i32
    %57 = arith.addi %56, %c7_i32 : i32
    %58 = arith.index_cast %57 : i32 to index
    %59 = memref.load %arg1[%58] : memref<16xi32, #tpu.memory_space<smem>>
    %c7_i32_35 = arith.constant 7 : i32
    %c0_i32_36 = arith.constant 0 : i32
    %60 = tpu.memref_slice %arg2[%59, %c0_i32_36] : memref<64x32xf32, #tpu.memory_space<any>> -> memref<1x32xf32, #tpu.memory_space<any>>
    %c7_i32_37 = arith.constant 7 : i32
    %c0_i32_38 = arith.constant 0 : i32
    %61 = tpu.memref_slice %arg3[%c7_i32_37, %c0_i32_38] : memref<8x32xf32, #tpu.memory_space<vmem>> -> memref<1x32xf32, #tpu.memory_space<vmem>>
    %62 = tpu.memref_slice %arg4[%c7_i32_35] : memref<8x!tpu.dma_semaphore, #tpu.memory_space<semaphore_mem>> -> memref<1x!tpu.dma_semaphore, #tpu.memory_space<semaphore_mem>>
    %63 = tpu.memref_squeeze %62 : memref<1x!tpu.dma_semaphore, #tpu.memory_space<semaphore_mem>> -> memref<!tpu.dma_semaphore, #tpu.memory_space<semaphore_mem>>
    tpu.enqueue_dma source(%60 : memref<1x32xf32, #tpu.memory_space<any>>) target(%61 : memref<1x32xf32, #tpu.memory_space<vmem>>) target_semaphore(%63 : memref<!tpu.dma_semaphore, #tpu.memory_space<semaphore_mem>>)
    %c0_i32_39 = arith.constant 0 : i32
    %c0_i32_40 = arith.constant 0 : i32
    %64 = tpu.memref_slice %arg2[%3, %c0_i32_40] : memref<64x32xf32, #tpu.memory_space<any>> -> memref<1x32xf32, #tpu.memory_space<any>>
    %c0_i32_41 = arith.constant 0 : i32
    %c0_i32_42 = arith.constant 0 : i32
    %65 = tpu.memref_slice %arg3[%c0_i32_41, %c0_i32_42] : memref<8x32xf32, #tpu.memory_space<vmem>> -> memref<1x32xf32, #tpu.memory_space<vmem>>
    %66 = tpu.memref_slice %arg4[%c0_i32_39] : memref<8x!tpu.dma_semaphore, #tpu.memory_space<semaphore_mem>> -> memref<1x!tpu.dma_semaphore, #tpu.memory_space<semaphore_mem>>
    %67 = tpu.memref_squeeze %66 : memref<1x!tpu.dma_semaphore, #tpu.memory_space<semaphore_mem>> -> memref<!tpu.dma_semaphore, #tpu.memory_space<semaphore_mem>>
    tpu.wait_dma2 semaphore(%67 : memref<!tpu.dma_semaphore, #tpu.memory_space<semaphore_mem>>) src(%64 : memref<1x32xf32, #tpu.memory_space<any>>) dst(%65 : memref<1x32xf32, #tpu.memory_space<vmem>>)
    %c1_i32_43 = arith.constant 1 : i32
    %c0_i32_44 = arith.constant 0 : i32
    %68 = tpu.memref_slice %arg2[%11, %c0_i32_44] : memref<64x32xf32, #tpu.memory_space<any>> -> memref<1x32xf32, #tpu.memory_space<any>>
    %c1_i32_45 = arith.constant 1 : i32
    %c0_i32_46 = arith.constant 0 : i32
    %69 = tpu.memref_slice %arg3[%c1_i32_45, %c0_i32_46] : memref<8x32xf32, #tpu.memory_space<vmem>> -> memref<1x32xf32, #tpu.memory_space<vmem>>
    %70 = tpu.memref_slice %arg4[%c1_i32_43] : memref<8x!tpu.dma_semaphore, #tpu.memory_space<semaphore_mem>> -> memref<1x!tpu.dma_semaphore, #tpu.memory_space<semaphore_mem>>
    %71 = tpu.memref_squeeze %70 : memref<1x!tpu.dma_semaphore, #tpu.memory_space<semaphore_mem>> -> memref<!tpu.dma_semaphore, #tpu.memory_space<semaphore_mem>>
    tpu.wait_dma2 semaphore(%71 : memref<!tpu.dma_semaphore, #tpu.memory_space<semaphore_mem>>) src(%68 : memref<1x32xf32, #tpu.memory_space<any>>) dst(%69 : memref<1x32xf32, #tpu.memory_space<vmem>>)
    %c2_i32_47 = arith.constant 2 : i32
    %c0_i32_48 = arith.constant 0 : i32
    %72 = tpu.memref_slice %arg2[%19, %c0_i32_48] : memref<64x32xf32, #tpu.memory_space<any>> -> memref<1x32xf32, #tpu.memory_space<any>>
    %c2_i32_49 = arith.constant 2 : i32
    %c0_i32_50 = arith.constant 0 : i32
    %73 = tpu.memref_slice %arg3[%c2_i32_49, %c0_i32_50] : memref<8x32xf32, #tpu.memory_space<vmem>> -> memref<1x32xf32, #tpu.memory_space<vmem>>
    %74 = tpu.memref_slice %arg4[%c2_i32_47] : memref<8x!tpu.dma_semaphore, #tpu.memory_space<semaphore_mem>> -> memref<1x!tpu.dma_semaphore, #tpu.memory_space<semaphore_mem>>
    %75 = tpu.memref_squeeze %74 : memref<1x!tpu.dma_semaphore, #tpu.memory_space<semaphore_mem>> -> memref<!tpu.dma_semaphore, #tpu.memory_space<semaphore_mem>>
    tpu.wait_dma2 semaphore(%75 : memref<!tpu.dma_semaphore, #tpu.memory_space<semaphore_mem>>) src(%72 : memref<1x32xf32, #tpu.memory_space<any>>) dst(%73 : memref<1x32xf32, #tpu.memory_space<vmem>>)
    %c3_i32_51 = arith.constant 3 : i32
    %c0_i32_52 = arith.constant 0 : i32
    %76 = tpu.memref_slice %arg2[%27, %c0_i32_52] : memref<64x32xf32, #tpu.memory_space<any>> -> memref<1x32xf32, #tpu.memory_space<any>>
    %c3_i32_53 = arith.constant 3 : i32
    %c0_i32_54 = arith.constant 0 : i32
    %77 = tpu.memref_slice %arg3[%c3_i32_53, %c0_i32_54] : memref<8x32xf32, #tpu.memory_space<vmem>> -> memref<1x32xf32, #tpu.memory_space<vmem>>
    %78 = tpu.memref_slice %arg4[%c3_i32_51] : memref<8x!tpu.dma_semaphore, #tpu.memory_space<semaphore_mem>> -> memref<1x!tpu.dma_semaphore, #tpu.memory_space<semaphore_mem>>
    %79 = tpu.memref_squeeze %78 : memref<1x!tpu.dma_semaphore, #tpu.memory_space<semaphore_mem>> -> memref<!tpu.dma_semaphore, #tpu.memory_space<semaphore_mem>>
    tpu.wait_dma2 semaphore(%79 : memref<!tpu.dma_semaphore, #tpu.memory_space<semaphore_mem>>) src(%76 : memref<1x32xf32, #tpu.memory_space<any>>) dst(%77 : memref<1x32xf32, #tpu.memory_space<vmem>>)
    %c4_i32_55 = arith.constant 4 : i32
    %c0_i32_56 = arith.constant 0 : i32
    %80 = tpu.memref_slice %arg2[%35, %c0_i32_56] : memref<64x32xf32, #tpu.memory_space<any>> -> memref<1x32xf32, #tpu.memory_space<any>>
    %c4_i32_57 = arith.constant 4 : i32
    %c0_i32_58 = arith.constant 0 : i32
    %81 = tpu.memref_slice %arg3[%c4_i32_57, %c0_i32_58] : memref<8x32xf32, #tpu.memory_space<vmem>> -> memref<1x32xf32, #tpu.memory_space<vmem>>
    %82 = tpu.memref_slice %arg4[%c4_i32_55] : memref<8x!tpu.dma_semaphore, #tpu.memory_space<semaphore_mem>> -> memref<1x!tpu.dma_semaphore, #tpu.memory_space<semaphore_mem>>
    %83 = tpu.memref_squeeze %82 : memref<1x!tpu.dma_semaphore, #tpu.memory_space<semaphore_mem>> -> memref<!tpu.dma_semaphore, #tpu.memory_space<semaphore_mem>>
    tpu.wait_dma2 semaphore(%83 : memref<!tpu.dma_semaphore, #tpu.memory_space<semaphore_mem>>) src(%80 : memref<1x32xf32, #tpu.memory_space<any>>) dst(%81 : memref<1x32xf32, #tpu.memory_space<vmem>>)
    %c5_i32_59 = arith.constant 5 : i32
    %c0_i32_60 = arith.constant 0 : i32
    %84 = tpu.memref_slice %arg2[%43, %c0_i32_60] : memref<64x32xf32, #tpu.memory_space<any>> -> memref<1x32xf32, #tpu.memory_space<any>>
    %c5_i32_61 = arith.constant 5 : i32
    %c0_i32_62 = arith.constant 0 : i32
    %85 = tpu.memref_slice %arg3[%c5_i32_61, %c0_i32_62] : memref<8x32xf32, #tpu.memory_space<vmem>> -> memref<1x32xf32, #tpu.memory_space<vmem>>
    %86 = tpu.memref_slice %arg4[%c5_i32_59] : memref<8x!tpu.dma_semaphore, #tpu.memory_space<semaphore_mem>> -> memref<1x!tpu.dma_semaphore, #tpu.memory_space<semaphore_mem>>
    %87 = tpu.memref_squeeze %86 : memref<1x!tpu.dma_semaphore, #tpu.memory_space<semaphore_mem>> -> memref<!tpu.dma_semaphore, #tpu.memory_space<semaphore_mem>>
    tpu.wait_dma2 semaphore(%87 : memref<!tpu.dma_semaphore, #tpu.memory_space<semaphore_mem>>) src(%84 : memref<1x32xf32, #tpu.memory_space<any>>) dst(%85 : memref<1x32xf32, #tpu.memory_space<vmem>>)
    %c6_i32_63 = arith.constant 6 : i32
    %c0_i32_64 = arith.constant 0 : i32
    %88 = tpu.memref_slice %arg2[%51, %c0_i32_64] : memref<64x32xf32, #tpu.memory_space<any>> -> memref<1x32xf32, #tpu.memory_space<any>>
    %c6_i32_65 = arith.constant 6 : i32
    %c0_i32_66 = arith.constant 0 : i32
    %89 = tpu.memref_slice %arg3[%c6_i32_65, %c0_i32_66] : memref<8x32xf32, #tpu.memory_space<vmem>> -> memref<1x32xf32, #tpu.memory_space<vmem>>
    %90 = tpu.memref_slice %arg4[%c6_i32_63] : memref<8x!tpu.dma_semaphore, #tpu.memory_space<semaphore_mem>> -> memref<1x!tpu.dma_semaphore, #tpu.memory_space<semaphore_mem>>
    %91 = tpu.memref_squeeze %90 : memref<1x!tpu.dma_semaphore, #tpu.memory_space<semaphore_mem>> -> memref<!tpu.dma_semaphore, #tpu.memory_space<semaphore_mem>>
    tpu.wait_dma2 semaphore(%91 : memref<!tpu.dma_semaphore, #tpu.memory_space<semaphore_mem>>) src(%88 : memref<1x32xf32, #tpu.memory_space<any>>) dst(%89 : memref<1x32xf32, #tpu.memory_space<vmem>>)
    %c7_i32_67 = arith.constant 7 : i32
    %c0_i32_68 = arith.constant 0 : i32
    %92 = tpu.memref_slice %arg2[%59, %c0_i32_68] : memref<64x32xf32, #tpu.memory_space<any>> -> memref<1x32xf32, #tpu.memory_space<any>>
    %c7_i32_69 = arith.constant 7 : i32
    %c0_i32_70 = arith.constant 0 : i32
    %93 = tpu.memref_slice %arg3[%c7_i32_69, %c0_i32_70] : memref<8x32xf32, #tpu.memory_space<vmem>> -> memref<1x32xf32, #tpu.memory_space<vmem>>
    %94 = tpu.memref_slice %arg4[%c7_i32_67] : memref<8x!tpu.dma_semaphore, #tpu.memory_space<semaphore_mem>> -> memref<1x!tpu.dma_semaphore, #tpu.memory_space<semaphore_mem>>
    %95 = tpu.memref_squeeze %94 : memref<1x!tpu.dma_semaphore, #tpu.memory_space<semaphore_mem>> -> memref<!tpu.dma_semaphore, #tpu.memory_space<semaphore_mem>>
    tpu.wait_dma2 semaphore(%95 : memref<!tpu.dma_semaphore, #tpu.memory_space<semaphore_mem>>) src(%92 : memref<1x32xf32, #tpu.memory_space<any>>) dst(%93 : memref<1x32xf32, #tpu.memory_space<vmem>>)
    return
  }
  func.func @transform_1(%arg0: i32, %arg1: memref<16xi32, #tpu.memory_space<smem>>) -> (i32, i32) {
    %c0_i32 = arith.constant 0 : i32
    %c0_i32_0 = arith.constant 0 : i32
    return %arg0, %c0_i32 : i32, i32
  }
}

</mosaic_0001>

<bundles_post_ra>
// kernel: tpu_custom_call.1
= control target key start
LH: loop header
LB: loop body
LE: loop exit
PB: predicated region body
PF: predicated region fallthrough
CT: control target
= control target key end

     0   :  { %s962_s0 = inlined_call_operand.vmem [shape: s32[16], index: 0, kind: input, shape index: {}]   ;;  %s963_s1 = inlined_call_operand.vmem [shape: f32[64,32], index: 1, kind: input, shape index: {}]   ;;  %s964_s2 = inlined_call_operand.hbm [shape: f32[16,32], index: 2, kind: output, shape index: {}]  }
   0x1   :  { %s7_s11 = sshll.u32 %s962_s0, 4  ;;  %s8_s11 = int_to_ptr.vmem [resolvable:$true] %s7_s11 }
   0x2   :  { %s731_s12 = scalar_lea.vmem %s8_s11, 16  ;;  %p736_p1 = scmp.lt.s32.totalorder %s8_s11, %s8_s11 }
   0x3   :  { %p732_p0 = scmp.ne.s32.totalorder %s8_s11, %s731_s12  ;;  %p737_p2 = scmp.lt.s32.totalorder %s731_s12, %s731_s12 }
   0x5   :  { %p738_p3 = por %p737_p2, %p736_p1 }
   0x7   :  { %p739_p4 = pnand %p738_p3, %p732_p0 }
   0x9   :  { %742 = shalt.err (!%p739_p4)  }
   0xa   :  { %s817_s13 = smov [#allocation4]  }
   0xb   :  { %10 = dma.vmem_to_smem %s8_s11, 16, %s817_s13, [#allocation3] }
   0xc   :  { %783 = dma.done.wait [#allocation3], 16 }
   0xd   :  { %784 = vsyncadd [#allocation3], 4294967280 }
   0xe   :  { %12 = sfence }
   0xf   :  { %13 = vsyncpa [#allocation6], 0 }
  0x10   :  { %15 = vsyncpa [#allocation6 + $0x1], 0  ;;  %s837_s14 = smov 0   ;;  %s839_s15 = smov 0  }
  0x11   :  { %s841_s0 = smov 0  }
  0x12 LB: > { %s668_s16 = sadd.s32 4294967295, %s815_s0   ;;  %s854_s17 = sadd.s32 1, %s815_s0   ;;  %s815_s0 = sphi %s841_s0, %s969_s0   ;;  %s811_s15 = sphi %s839_s15, %s968_s15   ;;  %s807_s14 = sphi %s837_s14, %s967_s14  }
  0x13   : > { %s24_s18 = ssub.s32 %s815_s0, %s854_s17  ;;  %s27_s19 = sadd.s32 1, %s811_s15 }
  0x14   : > { %p25_p5 = scmp.eq.s32.totalorder %s24_s18, 0  ;;  %p669_p6 = scmp.ne.s32.totalorder %s24_s18, 0 }
  0x15   : > { %p31_p7 = scmp.eq.s32.totalorder %s815_s0, 1  ;;  %p36_p8 = scmp.ne.s32.totalorder %s811_s15, %s807_s14 }
  0x16   : > { %s863_s20 = scalar_select %p25_p5, %s811_s15, %s27_s19  }
  0x17   : > { %p865_p9 = por %p669_p6, %p31_p7  ;;  %p37_p10 = scmp.eq.s32.totalorder %s668_s16, 1 }
  0x18   : > { %p670_p12 = scmp.ge.s32.totalorder %s815_s0, 2 }
  0x19   : > { %p869_p11 = por %p37_p10, %p36_p8  ;;  %s51_s23 = sand.u32 (!%p670_p12), 1, %s811_s15  }
  0x1a   : > { %46 = sbr.rel (%p670_p12) target bundleno = 146 (0x92), region = 12  ;;  %s876_s24 = sshll.u32 (!%p670_p12), %s815_s0, 3 }
  0x1b   : > { %s55_s25 = sld [smem:[#allocation4 + %s876_s24]] (!%p670_p12)  ;;  %s671_s26 = sshll.u32 (!%p670_p12), %s51_s23, 3 }
  0x1c   : > { %s884_s30 = scalar_lea.vmem (!%p670_p12), [#allocation5], %s671_s26 }
  0x21   : > { %s56_s29 = scalar_lea.vmem %s963_s1, %s55_s25 }
  0x22   : > { %v74_v0 = vld [vmem:[%s56_s29] sm:$0x1] }
  0x23   : > { %75 = vst [vmem:[%s884_s30] sm:$0x1] %v74_v0 }
  0x24   : > { %100 = vsyncadd [#allocation2], 16  ;;  %s101_s3 = sadd.s32 1, %s876_s24 }
  0x25   : > { %s102_s4 = sld [smem:[#allocation4 + %s101_s3]] }
  0x2b   : > { %s103_s7 = scalar_lea.vmem %s963_s1, %s102_s4 }
  0x2c   : > { %v123_v1 = vld [vmem:[%s103_s7] sm:$0x1] }
  0x2d   : > { %674 = vst [vmem:[%s884_s30 + $0x1] sm:$0x1] %v123_v1 }
  0x2e   : > { %149 = vsyncadd [#allocation2 + $0x1], 16  ;;  %s150_s8 = sadd.s32 2, %s876_s24 }
  0x2f   : > { %s151_s9 = sld [smem:[#allocation4 + %s150_s8]] }
  0x35   : > { %s152_s12 = scalar_lea.vmem %s963_s1, %s151_s9 }
  0x36   : > { %v172_v2 = vld [vmem:[%s152_s12] sm:$0x1] }
  0x37   : > { %676 = vst [vmem:[%s884_s30 + $0x2] sm:$0x1] %v172_v2 }
  0x38   : > { %198 = vsyncadd [#allocation2 + $0x2], 16  ;;  %s199_s13 = sadd.s32 3, %s876_s24 }
  0x39   : > { %s200_s16 = sld [smem:[#allocation4 + %s199_s13]] }
  0x3f   : > { %s201_s25 = scalar_lea.vmem %s963_s1, %s200_s16 }
  0x40   : > { %v221_v3 = vld [vmem:[%s201_s25] sm:$0x1] }
  0x41   : > { %678 = vst [vmem:[%s884_s30 + $0x3] sm:$0x1] %v221_v3 }
  0x42   : > { %247 = vsyncadd [#allocation2 + $0x3], 16  ;;  %s248_s26 = sadd.s32 4, %s876_s24 }
  0x43   : > { %s249_s27 = sld [smem:[#allocation4 + %s248_s26]] }
  0x49   : > { %s250_s3 = scalar_lea.vmem %s963_s1, %s249_s27 }
  0x4a   : > { %v270_v4 = vld [vmem:[%s250_s3] sm:$0x1] }
  0x4b   : > { %680 = vst [vmem:[%s884_s30 + $0x4] sm:$0x1] %v270_v4 }
  0x4c   : > { %296 = vsyncadd [#allocation2 + $0x4], 16  ;;  %s297_s4 = sadd.s32 5, %s876_s24 }
  0x4d   : > { %s298_s5 = sld [smem:[#allocation4 + %s297_s4]] }
  0x53   : > { %s299_s8 = scalar_lea.vmem %s963_s1, %s298_s5 }
  0x54   : > { %v319_v5 = vld [vmem:[%s299_s8] sm:$0x1] }
  0x55   : > { %682 = vst [vmem:[%s884_s30 + $0x5] sm:$0x1] %v319_v5 }
  0x56   : > { %345 = vsyncadd [#allocation2 + $0x5], 16  ;;  %s346_s9 = sadd.s32 6, %s876_s24 }
  0x57   : > { %s347_s10 = sld [smem:[#allocation4 + %s346_s9]] }
  0x5d   : > { %s348_s13 = scalar_lea.vmem %s963_s1, %s347_s10 }
  0x5e   : > { %v368_v6 = vld [vmem:[%s348_s13] sm:$0x1] }
  0x5f   : > { %684 = vst [vmem:[%s884_s30 + $0x6] sm:$0x1] %v368_v6 }
  0x60   : > { %394 = vsyncadd [#allocation2 + $0x6], 16  ;;  %s395_s16 = sadd.s32 7, %s876_s24 }
  0x61   : > { %s396_s18 = sld [smem:[#allocation4 + %s395_s16]] }
  0x67   : > { %s397_s26 = scalar_lea.vmem %s963_s1, %s396_s18 }
  0x68   : > { %v417_v7 = vld [vmem:[%s397_s26] sm:$0x1] }
  0x69   : > { %686 = vst [vmem:[%s884_s30 + $0x7] sm:$0x1] %v417_v7 }
  0x6a   : > { %443 = vsyncadd [#allocation2 + $0x7], 16 }
  0x6b   : > { %785 = dma.done.wait [#allocation2], 16 }
  0x6c   : > { %786 = vsyncadd [#allocation2], 4294967280 }
  0x6d   : > { %787 = dma.done.wait [#allocation2 + $0x1], 16 }
  0x6e   : > { %788 = vsyncadd [#allocation2 + $0x1], 4294967280 }
  0x6f   : > { %789 = dma.done.wait [#allocation2 + $0x2], 16 }
  0x70   : > { %790 = vsyncadd [#allocation2 + $0x2], 4294967280 }
  0x71   : > { %791 = dma.done.wait [#allocation2 + $0x3], 16 }
  0x72   : > { %792 = vsyncadd [#allocation2 + $0x3], 4294967280 }
  0x73   : > { %793 = dma.done.wait [#allocation2 + $0x4], 16 }
  0x74   : > { %794 = vsyncadd [#allocation2 + $0x4], 4294967280 }
  0x75   : > { %795 = dma.done.wait [#allocation2 + $0x5], 16 }
  0x76   : > { %796 = vsyncadd [#allocation2 + $0x5], 4294967280 }
  0x77   : > { %797 = dma.done.wait [#allocation2 + $0x6], 16 }
  0x78   : > { %798 = vsyncadd [#allocation2 + $0x6], 4294967280 }
  0x79   : > { %799 = dma.done.wait [#allocation2 + $0x7], 16 }
  0x7a   : > { %800 = vsyncadd [#allocation2 + $0x7], 4294967280  ;;  %s688_s24 = sshll.u32 %s815_s0, 7  ;;  %s475_s3 = sshll.u32 %s884_s30, 4  ;;  %s476_s3 = int_to_ptr.vmem [resolvable:$true] %s475_s3 }
  0x7b   : > { %s926_s29 = scalar_lea.hbm %s964_s2, %s688_s24  ;;  %s462_s4 = scalar_lea.sflag [#allocation6], %s51_s23 }
  0x7c   : > { %s743_s5 = scalar_lea.vmem %s476_s3, 128  ;;  %s818_s6 = smov [#allocation5]  }
  0x7d   : > { %p744_p13 = scmp.ne.s32.totalorder %s476_s3, %s743_s5  ;;  %s747_s7 = sshll.u32 %s818_s6, 4  ;;  %s748_s7 = int_to_ptr.vmem [resolvable:$false] %s747_s7 }
  0x7e   : > { %s749_s8 = scalar_lea.vmem %s748_s7, 256  ;;  %p750_p2 = scmp.lt.s32.totalorder %s476_s3, %s748_s7 }
  0x7f   : > { %p745_p0 = pnand %p744_p13, %p865_p9  ;;  %p751_p3 = scmp.lt.s32.totalorder %s749_s8, %s743_s5 }
  0x81   : > { %p746_p1 = pneg %p745_p0  ;;  %p752_p4 = por %p751_p3, %p750_p2 }
  0x83   : > { %p753_p5 = pnand %p752_p4, %p746_p1 }
  0x85   : > { %756 = shalt.err (!%p753_p5)
}
  0x86   : > { %s757_s23 = scalar_lea.hbm %s926_s29, 128  ;;  %s761_s10 = scalar_lea.hbm %s964_s2, 256 }
  0x87   : > { %p758_p6 = scmp.ne.s32.totalorder %s926_s29, %s757_s23  ;;  %p762_p10 = scmp.lt.u32.totalorder %s926_s29, %s964_s2 }
  0x88   : > { %p763_p12 = scmp.lt.u32.totalorder %s761_s10, %s757_s23  ;;  %p765_p0 = scmp.lt.u32.totalorder %s757_s23, %s926_s29 }
  0x89   : > { %p759_p7 = pnand %p758_p6, %p865_p9 }
  0x8a   : > { %p764_p13 = por %p763_p12, %p762_p10 }
  0x8b   : > { %p760_p8 = pneg %p759_p7 }
  0x8c   : > { %p766_p1 = por %p765_p0, %p764_p13 }
  0x8e   : > { %p767_p2 = pnand %p766_p1, %p760_p8 }
  0x90   : > { %770 = shalt.err (!%p767_p2)
}
  0x91   : > { %699 = dma.vmem_to_hbm [thread:$0]  (%p865_p9), %s476_s3, 128, %s926_s29, %s462_s4  }
  0x92 PF: > { %p705_p3 = scmp.ge.s32.totalorder %s815_s0, 1  ;;  %s487_s13 = sand.u32 1, %s807_s14  }
  0x93   : > { %s488_s16 = scalar_lea.sflag [#allocation6], %s487_s13 }
  0x94   : > { %p702_p4 = pnand %p705_p3, %p869_p11 }
  0x96   : > { %802 = dma.done.wait (!%p702_p4), %s488_s16, 128  }
  0x97   : > { %804 = vsyncadd (!%p702_p4), %s488_s16, 4294967168  ;;  %p18_p5 = scmp.ge.s32.totalorder %s854_s17, 3   ;;  %s967_s14 = smov %s811_s15 }
  0x98   : > { %s968_s15 = smov %s863_s20  ;;  %s969_s0 = smov %s854_s17 }
  0x99   :  { %20 = sbr.rel (!%p18_p5) target bundleno = 18 (0x12), region = 393 }
  0xa0   :  { %493 = vsyncpa [#allocation6], 1 }
  0xa1   :  { %495 = vsyncpa [#allocation6 + $0x1], 1 }
  0xa2   :  { %496 = vsyncmov [#allocation2] }
  0xa5   :  { %s497_s0 = vpop.sfrf %496 }
  0xa6   :  { %p691_p9 = scmp.ne.s32.totalorder %s497_s0, 0 }
  0xa8   :  { %501 = shalt.err (%p691_p9)  }
  0xa9   :  { %503 = vsyncmov [#allocation2 + $0x1] }
  0xac   :  { %s504_s21 = vpop.sfrf %503 }
  0xad   :  { %p692_p11 = scmp.ne.s32.totalorder %s504_s21, 0 }
  0xaf   :  { %508 = shalt.err (%p692_p11)  }
  0xb0   :  { %510 = vsyncmov [#allocation2 + $0x2] }
  0xb3   :  { %s511_s22 = vpop.sfrf %510 }
  0xb4   :  { %p693_p6 = scmp.ne.s32.totalorder %s511_s22, 0 }
  0xb6   :  { %515 = shalt.err (%p693_p6)  }
  0xb7   :  { %517 = vsyncmov [#allocation2 + $0x3] }
  0xba   :  { %s518_s18 = vpop.sfrf %517 }
  0xbb   :  { %p694_p7 = scmp.ne.s32.totalorder %s518_s18, 0 }
  0xbd   :  { %522 = shalt.err (%p694_p7)  }
  0xbe   :  { %524 = vsyncmov [#allocation2 + $0x4] }
  0xc1   :  { %s525_s17 = vpop.sfrf %524 }
  0xc2   :  { %p695_p8 = scmp.ne.s32.totalorder %s525_s17, 0 }
  0xc4   :  { %529 = shalt.err (%p695_p8)  }
  0xc5   :  { %531 = vsyncmov [#allocation2 + $0x5] }
  0xc8   :  { %s532_s1 = vpop.sfrf %531 }
  0xc9   :  { %p696_p10 = scmp.ne.s32.totalorder %s532_s1, 0 }
  0xcb   :  { %536 = shalt.err (%p696_p10)  }
  0xcc   :  { %538 = vsyncmov [#allocation2 + $0x6] }
  0xcf   :  { %s539_s2 = vpop.sfrf %538 }
  0xd0   :  { %p697_p12 = scmp.ne.s32.totalorder %s539_s2, 0 }
  0xd2   :  { %543 = shalt.err (%p697_p12)  }
  0xd3   :  { %545 = vsyncmov [#allocation2 + $0x7] }
  0xd6   :  { %s546_s14 = vpop.sfrf %545 }
  0xd7   :  { %p698_p13 = scmp.ne.s32.totalorder %s546_s14, 0 }
  0xd9   :  { %550 = shalt.err (%p698_p13)  }

</bundles_post_ra>
